<compile_context>
chip_gen: v6e
topology: v6e:2x2x1
jax: 0.10.0
libtpu: 0.0.40
codegen_flags: <defaults>
</compile_context>

<pallas_src>
import functools

import jax
import jax.numpy as jnp
from jax.experimental import pallas as pl
from jax.experimental.pallas import tpu as pltpu


def _round_up(x, m):
    return -(-x // m) * m


def _padded_bytes(rows, cols, itemsize):
    """VMEM footprint of a 2-D tile after (8, 128) sublane/lane padding."""
    return _round_up(max(int(rows), 1), 8) * _round_up(max(int(cols), 1), 128) * itemsize


# ---------------------------------------------------------------------------
# Fused single-pass kernel: z resident in VMEM, beta + apply in one shot.
# ---------------------------------------------------------------------------
def _fused_kernel(zw_ref, w1b_ref, b1b_ref, w2b_ref, out_ref, *, n_nodes, n_meta, feat):
    zw = zw_ref[...]                                                      # (N, M*D)
    h = jnp.tanh(jnp.dot(zw, w1b_ref[...],
                         preferred_element_type=jnp.float32) + b1b_ref[...])  # (N, M*H)
    s = jnp.dot(h, w2b_ref[...], preferred_element_type=jnp.float32)      # (N, M)
    scores = jnp.sum(s, axis=0, keepdims=True) * (1.0 / n_nodes)          # (1, M)
    mx = jnp.max(scores, axis=-1, keepdims=True)
    e = jnp.exp(scores - mx)
    beta = e / jnp.sum(e, axis=-1, keepdims=True)                         # (1, M)

    # Apply: out[n, :] = sum_m beta_m * z[n, m, :]  (z is read once, resident).
    acc = beta[:, 0:1] * zw[:, 0:feat].astype(jnp.float32)
    for m in range(1, n_meta):
        acc = acc + beta[:, m:m + 1] * zw[:, m * feat:(m + 1) * feat].astype(jnp.float32)
    out_ref[...] = acc.astype(out_ref.dtype)


# ---------------------------------------------------------------------------
# Pass 1: streamed score reduction over node tiles; beta finalized on last step.
# ---------------------------------------------------------------------------
def _score_kernel(zw_ref, w1b_ref, b1b_ref, w2b_ref, beta_ref, acc_ref, *, n_nodes, tn):
    i = pl.program_id(0)

    @pl.when(i == 0)
    def _():
        acc_ref[...] = jnp.zeros_like(acc_ref)

    # One block-diagonal MXU matmul per tile (no per-metapath column slices,
    # no per-slice casts: native dtype straight into the MXU, f32 accumulate).
    h = jnp.tanh(jnp.dot(zw_ref[...], w1b_ref[...],
                         preferred_element_type=jnp.float32) + b1b_ref[...])  # (tn, M*H)
    s = jnp.dot(h, w2b_ref[...], preferred_element_type=jnp.float32)          # (tn, M)

    # cdiv grid: mask rows past N on the (possibly partial) last tile.
    row = i * tn + jax.lax.broadcasted_iota(jnp.int32, s.shape, 0)
    s = jnp.where(row < n_nodes, s, 0.0)
    acc_ref[...] += jnp.sum(s, axis=0, keepdims=True)                         # (1, M)

    @pl.when(i == pl.num_programs(0) - 1)
    def _():
        scores = acc_ref[...] * (1.0 / n_nodes)          # mean over all N nodes
        mx = jnp.max(scores, axis=-1, keepdims=True)
        e = jnp.exp(scores - mx)
        beta_ref[...] = e / jnp.sum(e, axis=-1, keepdims=True)


# ---------------------------------------------------------------------------
# Pass 2: out_tile = z_tile @ B  (beta folded into a block-identity matrix).
# ---------------------------------------------------------------------------
def _apply_kernel(zg_ref, bmat_ref, out_ref):
    out_ref[...] = jnp.dot(zg_ref[...], bmat_ref[...],
                           preferred_element_type=jnp.float32).astype(out_ref.dtype)


def semantic_attention(z, w1, b1, w2, *, block_rows=None, force_two_pass=False):
    """z: (N, M, D); w1: (D, H); b1: (H,) or (1, H); w2: (H, 1).  Returns (N, D)."""
    N, M, D = z.shape
    H = w1.shape[-1]
    isz = z.dtype.itemsize

    # Free (metadata-only) reshapes / parameter prep in the wrapper, not the kernel.
    zw = z.reshape(N, M * D)                                               # row = node, lane-dense
    eye_m = jnp.eye(M, dtype=jnp.float32)
    w1_blk = jnp.kron(eye_m, w1.astype(jnp.float32)).astype(z.dtype)       # (M*D, M*H)
    b1_blk = jnp.tile(jnp.reshape(b1, (1, H)).astype(jnp.float32), (1, M)) # (1, M*H)
    w2_blk = jnp.kron(eye_m, jnp.reshape(w2, (H, 1)).astype(jnp.float32))  # (M*H, M)

    param_bytes = (_padded_bytes(M * D, M * H, isz)
                   + _padded_bytes(1, M * H, 4)
                   + _padded_bytes(M * H, M, 4))

    # ---- fused single-pass fast path: z read from HBM only once ----
    fused_need = (_padded_bytes(N, M * D, isz) + _padded_bytes(N, D, isz)
                  + 2 * _padded_bytes(N, M * H, 4) + param_bytes)
    if not force_two_pass and fused_need <= (20 << 20):      # conservative for v7x 64 MiB VMEM
        return pl.pallas_call(
            functools.partial(_fused_kernel, n_nodes=float(N), n_meta=M, feat=D),
            out_shape=jax.ShapeDtypeStruct((N, D), z.dtype),
            compiler_params=pltpu.CompilerParams(
                vmem_limit_bytes=int(min(56 << 20, max(32 << 20, 2 * fused_need)))),
        )(zw, w1_blk, b1_blk, w2_blk)

    # ---- pass 1: stream z, reduce per-metapath scores, finalize beta ----
    if block_rows is None:
        block_rows = (6 << 20) // max(1, M * D * isz)         # ~6 MiB z tile per pipeline buffer
    tn = max(8, min(_round_up(N, 8), (block_rows // 8) * 8))

    def _p1_need(t):
        return (2 * _padded_bytes(t, M * D, isz)               # double-buffered z tiles
                + 2 * _padded_bytes(t, M * H, 4)               # tanh intermediate headroom
                + param_bytes)

    while tn > 8 and _p1_need(tn) > (44 << 20):
        tn = max(8, (tn // 2 // 8) * 8)
    vmem1 = int(min(56 << 20, max(32 << 20, _p1_need(tn) + (4 << 20))))

    z_spec = pl.BlockSpec((tn, M * D), lambda i: (i, 0))
    resident = lambda r, c: pl.BlockSpec((r, c), lambda i: (0, 0))   # stays in VMEM

    beta = pl.pallas_call(
        functools.partial(_score_kernel, n_nodes=N, tn=tn),
        out_shape=jax.ShapeDtypeStruct((1, M), jnp.float32),
        grid=(pl.cdiv(N, tn),),
        in_specs=[z_spec, resident(M * D, M * H), resident(1, M * H), resident(M * H, M)],
        out_specs=resident(1, M),
        scratch_shapes=[pltpu.VMEM((1, M), jnp.float32)],
        compiler_params=pltpu.CompilerParams(
            dimension_semantics=("arbitrary",),                # carried reduction over node tiles
            vmem_limit_bytes=vmem1),
    )(zw, w1_blk, b1_blk, w2_blk)

    # ---- between passes: fold beta into a (row-grouped) block-identity matrix ----
    k = 1
    if D < 128 and 128 % D == 0:
        k = 128 // D
        while k > 1 and N % k:                                 # need a free contiguous regrouping
            k //= 2
    ng = N // k

    bmat = (beta.reshape(M, 1, 1) * jnp.eye(D, dtype=jnp.float32)).reshape(M * D, D)
    if k > 1:
        bmat = jnp.kron(jnp.eye(k, dtype=jnp.float32), bmat)  # (k*M*D, k*D), lane-dense output
    bmat = bmat.astype(z.dtype)
    zg = zw.reshape(ng, k * M * D)                             # k nodes per row (free reshape)

    # ---- pass 2: stream z again, out_tile = z_tile @ B on the MXU ----
    tng = max(8, min(_round_up(ng, 8), ((block_rows // k) // 8) * 8))

    def _p2_need(t):
        return (2 * _padded_bytes(t, k * M * D, isz)
                + 2 * _padded_bytes(t, k * D, isz)
                + _padded_bytes(k * M * D, k * D, isz))

    while tng > 8 and _p2_need(tng) > (44 << 20):
        tng = max(8, (tng // 2 // 8) * 8)
    vmem2 = int(min(56 << 20, max(32 << 20, _p2_need(tng) + (4 << 20))))

    out_g = pl.pallas_call(
        _apply_kernel,
        out_shape=jax.ShapeDtypeStruct((ng, k * D), z.dtype),
        grid=(pl.cdiv(ng, tng),),
        in_specs=[pl.BlockSpec((tng, k * M * D), lambda i: (i, 0)),
                  pl.BlockSpec((k * M * D, k * D), lambda i: (0, 0))],
        out_specs=pl.BlockSpec((tng, k * D), lambda i: (i, 0)),
        compiler_params=pltpu.CompilerParams(
            dimension_semantics=("parallel",),                 # independent tiles -> 2 TCs on v7x
            vmem_limit_bytes=vmem2),
    )(zg, bmat)
    return out_g.reshape(N, D)


def semantic_attention_ref(z, w1, b1, w2):
    """Pure-JAX reference mirroring the PyTorch forward."""
    zf = z.astype(jnp.float32)
    h = jnp.tanh(jnp.einsum("nmd,dh->nmh", zf, w1.astype(jnp.float32))
                 + jnp.reshape(b1, (1, 1, -1)).astype(jnp.float32))
    s = jnp.einsum("nmh,hk->nmk", h, w2.astype(jnp.float32))   # (N, M, 1)
    w = jnp.mean(s, axis=0)                                    # (M, 1)
    beta = jax.nn.softmax(w, axis=0)                           # (M, 1)
    return jnp.sum(beta[None, :, :] * zf, axis=1).astype(z.dtype)


if __name__ == "__main__":
    # Small shapes consistent with the module: N nodes, M metapaths, D features.
    N, M, D, H = 64, 4, 32, 32

    key = jax.random.PRNGKey(0)
    k_z, k_w1, k_b1, k_w2, k_z2 = jax.random.split(key, 5)

    z = jax.random.normal(k_z, (N, M, D), dtype=jnp.float32)
    lim1 = 1.0 / jnp.sqrt(D)
    lim2 = 1.0 / jnp.sqrt(H)
    w1 = jax.random.uniform(k_w1, (D, H), minval=-lim1, maxval=lim1, dtype=jnp.float32)
    b1 = jax.random.uniform(k_b1, (1, H), minval=-lim1, maxval=lim1, dtype=jnp.float32)
    w2 = jax.random.uniform(k_w2, (H, 1), minval=-lim2, maxval=lim2, dtype=jnp.float32)

    ref = semantic_attention_ref(z, w1, b1, w2)

    # 1) Fused single-pass fast path (z fits in VMEM at these shapes).
    out_fused = jax.block_until_ready(semantic_attention(z, w1, b1, w2))
    assert out_fused.shape == (N, D)
    assert jnp.allclose(out_fused, ref, atol=3e-4, rtol=3e-4), "fused path mismatch vs reference"

    # 2) Streamed two-pass path (block-diag score matmul + beta-matmul apply),
    #    grid of 4 node tiles.  Tolerance allows MXU multi-pass f32 rounding in
    #    the apply matmul (the reference applies beta elementwise).
    out_tiled = jax.block_until_ready(
        semantic_attention(z, w1, b1, w2, block_rows=16, force_two_pass=True))
    assert jnp.allclose(out_tiled, ref, atol=2e-3, rtol=2e-3), "two-pass path mismatch vs reference"

    # 3) Ragged N (not a multiple of the tile) exercises cdiv grid + last-tile masking.
    N2 = 52
    z2 = jax.random.normal(k_z2, (N2, M, D), dtype=jnp.float32)
    ref2 = semantic_attention_ref(z2, w1, b1, w2)
    out2 = jax.block_until_ready(
        semantic_attention(z2, w1, b1, w2, block_rows=16, force_two_pass=True))
    assert out2.shape == (N2, D)
    assert jnp.allclose(out2, ref2, atol=2e-3, rtol=2e-3), "ragged-N two-pass mismatch vs reference"

    print("KERNEL_OK")
</pallas_src>

<mosaic_0001>
module attributes {stable_mosaic.version = 11 : i64} {
  func.func @_fused_kernel(%arg0: memref<64x128xf32, #tpu.memory_space<vmem>>, %arg1: memref<128x128xf32, #tpu.memory_space<vmem>>, %arg2: memref<1x128xf32, #tpu.memory_space<vmem>>, %arg3: memref<128x4xf32, #tpu.memory_space<vmem>>, %arg4: memref<64x32xf32, #tpu.memory_space<vmem>>) attributes {dimension_semantics = [], scalar_prefetch = 0 : i64, scratch_operands = 0 : i64, tpu.core_type = #tpu.core_type<tc>} {
    %c0 = arith.constant 0 : index
    %c0_0 = arith.constant 0 : index
    %0 = vector.load %arg0[%c0, %c0_0] : memref<64x128xf32, #tpu.memory_space<vmem>>, vector<64x128xf32>
    %c0_1 = arith.constant 0 : index
    %c0_2 = arith.constant 0 : index
    %1 = vector.load %arg1[%c0_1, %c0_2] : memref<128x128xf32, #tpu.memory_space<vmem>>, vector<128x128xf32>
    %cst = arith.constant dense<0.000000e+00> : vector<64x128xf32>
    %2 = tpu.matmul %0, %1, %cst {dimension_numbers = #tpu.dot_dimension_numbers<[1], [0], [0], [1], [0, 0, 1, 1], [], []>} : vector<64x128xf32>, vector<128x128xf32>, vector<64x128xf32> -> vector<64x128xf32>
    %c0_3 = arith.constant 0 : index
    %c0_4 = arith.constant 0 : index
    %3 = vector.load %arg2[%c0_3, %c0_4] : memref<1x128xf32, #tpu.memory_space<vmem>>, vector<1x128xf32>
    %4 = vector.broadcast %3 : vector<1x128xf32> to vector<64x128xf32>
    %5 = arith.addf %2, %4 : vector<64x128xf32>
    %6 = math.tanh %5 : vector<64x128xf32>
    %c0_5 = arith.constant 0 : index
    %c0_6 = arith.constant 0 : index
    %7 = vector.load %arg3[%c0_5, %c0_6] : memref<128x4xf32, #tpu.memory_space<vmem>>, vector<128x4xf32>
    %cst_7 = arith.constant dense<0.000000e+00> : vector<64x4xf32>
    %8 = tpu.matmul %6, %7, %cst_7 {dimension_numbers = #tpu.dot_dimension_numbers<[1], [0], [0], [1], [0, 0, 1, 1], [], []>} : vector<64x128xf32>, vector<128x4xf32>, vector<64x4xf32> -> vector<64x4xf32>
    %cst_8 = arith.constant dense<0.000000e+00> : vector<4xf32>
    %9 = vector.multi_reduction <add>, %8, %cst_8 [0] : vector<64x4xf32> to vector<4xf32>
    %10 = vector.shape_cast %9 : vector<4xf32> to vector<1x4xf32>
    %cst_9 = arith.constant 1.562500e-02 : f32
    %11 = vector.broadcast %cst_9 : f32 to vector<1x4xf32>
    %12 = arith.mulf %10, %11 : vector<1x4xf32>
    %cst_10 = arith.constant dense<0xFF800000> : vector<1xf32>
    %13 = vector.multi_reduction <maximumf>, %12, %cst_10 [1] : vector<1x4xf32> to vector<1xf32>
    %14 = vector.shape_cast %13 : vector<1xf32> to vector<1x1xf32>
    %15 = vector.broadcast %14 : vector<1x1xf32> to vector<1x4xf32>
    %16 = arith.subf %12, %15 : vector<1x4xf32>
    %17 = math.exp %16 : vector<1x4xf32>
    %cst_11 = arith.constant dense<0.000000e+00> : vector<1xf32>
    %18 = vector.multi_reduction <add>, %17, %cst_11 [1] : vector<1x4xf32> to vector<1xf32>
    %19 = vector.shape_cast %18 : vector<1xf32> to vector<1x1xf32>
    %20 = vector.broadcast %19 : vector<1x1xf32> to vector<1x4xf32>
    %21 = arith.divf %17, %20 : vector<1x4xf32>
    %22 = vector.extract_strided_slice %21 {offsets = [0, 0], sizes = [1, 1], strides = [1, 1]} : vector<1x4xf32> to vector<1x1xf32>
    %23 = vector.extract_strided_slice %0 {offsets = [0, 0], sizes = [64, 32], strides = [1, 1]} : vector<64x128xf32> to vector<64x32xf32>
    %24 = vector.broadcast %22 : vector<1x1xf32> to vector<64x32xf32>
    %25 = arith.mulf %24, %23 : vector<64x32xf32>
    %26 = vector.extract_strided_slice %21 {offsets = [0, 1], sizes = [1, 1], strides = [1, 1]} : vector<1x4xf32> to vector<1x1xf32>
    %27 = vector.extract_strided_slice %0 {offsets = [0, 32], sizes = [64, 32], strides = [1, 1]} : vector<64x128xf32> to vector<64x32xf32>
    %28 = vector.broadcast %26 : vector<1x1xf32> to vector<64x32xf32>
    %29 = arith.mulf %28, %27 : vector<64x32xf32>
    %30 = arith.addf %25, %29 : vector<64x32xf32>
    %31 = vector.extract_strided_slice %21 {offsets = [0, 2], sizes = [1, 1], strides = [1, 1]} : vector<1x4xf32> to vector<1x1xf32>
    %32 = vector.extract_strided_slice %0 {offsets = [0, 64], sizes = [64, 32], strides = [1, 1]} : vector<64x128xf32> to vector<64x32xf32>
    %33 = vector.broadcast %31 : vector<1x1xf32> to vector<64x32xf32>
    %34 = arith.mulf %33, %32 : vector<64x32xf32>
    %35 = arith.addf %30, %34 : vector<64x32xf32>
    %36 = vector.extract_strided_slice %21 {offsets = [0, 3], sizes = [1, 1], strides = [1, 1]} : vector<1x4xf32> to vector<1x1xf32>
    %37 = vector.extract_strided_slice %0 {offsets = [0, 96], sizes = [64, 32], strides = [1, 1]} : vector<64x128xf32> to vector<64x32xf32>
    %38 = vector.broadcast %36 : vector<1x1xf32> to vector<64x32xf32>
    %39 = arith.mulf %38, %37 : vector<64x32xf32>
    %40 = arith.addf %35, %39 : vector<64x32xf32>
    %c0_12 = arith.constant 0 : index
    %c0_13 = arith.constant 0 : index
    %41 = vector.load %arg4[%c0_12, %c0_13] : memref<64x32xf32, #tpu.memory_space<vmem>>, vector<64x32xf32>
    tpu.vector_store %arg4[%c0_12, %c0_13], %40 {strides = array<i32>} : memref<64x32xf32, #tpu.memory_space<vmem>>, vector<64x32xf32>,
    return
  }
}

</mosaic_0001>

<bundles_post_ra>
// kernel: tpu_custom_call.1
= control target key start
LH: loop header
LB: loop body
LE: loop exit
PB: predicated region body
PF: predicated region fallthrough
CT: control target
= control target key end

     0   :  { %9 = vsyncpa [#allocation3], 0  ;;  %s706_s15 = smov [#allocation2]   ;;  %s965_s0 = inlined_call_operand.hbm [shape: f32[64,128], index: 0, kind: input, shape index: {}]   ;;  %s966_s1 = inlined_call_operand.vmem [shape: f32[128,128], index: 1, kind: input, shape index: {}]   ;;  %s967_s2 = inlined_call_operand.vmem [shape: f32[1,128], index: 2, kind: input, shape index: {}]   ;;  %s968_s3 = inlined_call_operand.vmem [shape: f32[128,4], index: 3, kind: input, shape index: {}]   ;;  %s969_s4 = inlined_call_operand.vmem [shape: f32[64,32], index: 4, kind: output, shape index: {}]  }
   0x1   :  { %s15_s16 = sshll.u32 %s706_s15, 4  ;;  %s16_s16 = int_to_ptr.vmem [resolvable:$true] %s15_s16 }
   0x2   :  { %s692_s17 = scalar_lea.vmem %s16_s16, 1024  ;;  %p697_p1 = scmp.lt.s32.totalorder %s16_s16, %s16_s16 }
   0x3   :  { %p693_p0 = scmp.ne.s32.totalorder %s16_s16, %s692_s17  ;;  %p698_p2 = scmp.lt.s32.totalorder %s692_s17, %s692_s17 }
   0x5   :  { %p699_p3 = por %p698_p2, %p697_p1 }
   0x7   :  { %p700_p4 = pnand %p699_p3, %p693_p0 }
   0x9   :  { %703 = shalt.err (!%p700_p4)
}
   0xa   :  { %s707_s18 = smov 128   ;;  %s708_s19 = smov 8  }
   0xb   :  { %21 = dma.hbm_to_vmem [thread:$0]  %s965_s0, 1024, %s16_s16, [#allocation3], %s707_s18, %s707_s18, %s708_s19  }
   0xc   :  { %704 = dma.done.wait [#allocation3], 1024  }
   0xd   :  { %705 = vsyncadd [#allocation3], 4294966272  ;;  %v54_v0 = vld [vmem:[%s966_s1 + $0x78] sm:$0xff]  ;;  %v53_v1 = vld [vmem:[%s966_s1 + $0x70] sm:$0xff]  ;;  %vm296_vm0 = vcmask 31744   ;;  %s715_s6 = smov 32  }
   0xe   :  { %562 = vmatprep.subr.mxu0 %v54_v0  ;;  %v52_v2 = vld [vmem:[%s966_s1 + $0x68] sm:$0xff]  ;;  %v51_v3 = vld [vmem:[%s966_s1 + $0x60] sm:$0xff]  ;;  %v50_v5 = vld [vmem:[%s966_s1 + $0x58] sm:$0xff]  ;;  %vm499_vm1 = vcmask 261120  }
   0xf   :  { %563 = vmatpush3.msra.mxu0 %v54_v0  ;;  %v756_v4 = vld [vmem:[#allocation2] sm:$0xff]  ;;  %v49_v6 = vld [vmem:[%s966_s1 + $0x50] sm:$0xff]  ;;  %v190_v7 = vld [vmem:[%s968_s3 + $0x78] sm:$0xff] }
  0x10   :  { %564 = vmatprep.subr.mxu0 %v53_v1  ;;  %594 = vmatprep.mubr.f32.mxu0 %v756_v4  ;;  %v189_v8 = vld [vmem:[%s968_s3 + $0x70] sm:$0xff]  ;;  %v48_v9 = vld [vmem:[%s966_s1 + $0x48] sm:$0xff]  ;;  %v47_v11 = vld [vmem:[%s966_s1 + $0x40] sm:$0xff] }
  0x11   :  { %565 = vmatpush3.msra.mxu0 %v53_v1  ;;  %606 = vmatprep.subr.mxu1 %v190_v7  ;;  %v188_v10 = vld [vmem:[%s968_s3 + $0x68] sm:$0xff]  ;;  %v187_v12 = vld [vmem:[%s968_s3 + $0x60] sm:$0xff]  ;;  %v46_v13 = vld [vmem:[%s966_s1 + $0x38] sm:$0xff] }
  0x12   :  { %566 = vmatprep.subr.mxu0 %v52_v2  ;;  %607 = vmatpush3.msra.mxu1 %v190_v7  ;;  %v186_v14 = vld [vmem:[%s968_s3 + $0x58] sm:$0xff]  ;;  %v45_v15 = vld [vmem:[%s966_s1 + $0x30] sm:$0xff]  ;;  %v44_v17 = vld [vmem:[%s966_s1 + $0x28] sm:$0xff] }
  0x13   :  { %567 = vmatpush3.msra.mxu0 %v52_v2  ;;  %608 = vmatprep.subr.mxu1 %v189_v8  ;;  %v185_v16 = vld [vmem:[%s968_s3 + $0x50] sm:$0xff]  ;;  %v43_v18 = vld [vmem:[%s966_s1 + $0x20] sm:$0xff]  ;;  %v42_v19 = vld [vmem:[%s966_s1 + $0x18] sm:$0xff] }
  0x14   :  { %568 = vmatprep.subr.mxu0 %v51_v3  ;;  %609 = vmatpush3.msra.mxu1 %v189_v8  ;;  %v41_v20 = vld [vmem:[%s966_s1 + $0x10] sm:$0xff]  ;;  %v40_v21 = vld [vmem:[%s966_s1 + $0x8] sm:$0xff]  ;;  %v39_v22 = vld [vmem:[%s966_s1] sm:$0xff] }
  0x15   :  { %569 = vmatpush3.msra.mxu0 %v51_v3  ;;  %610 = vmatprep.subr.mxu1 %v188_v10  ;;  %v813_v23 = vld [vmem:[#allocation2 + $0x8] sm:$0xff]  ;;  %v815_v24 = vld [vmem:[#allocation2 + $0x10] sm:$0xff]  ;;  %v819_v25 = vld [vmem:[#allocation2 + $0x18] sm:$0xff] }
  0x16   :  { %570 = vmatprep.subr.mxu0 %v50_v5  ;;  %611 = vmatpush3.msra.mxu1 %v188_v10  ;;  %v821_v26 = vld [vmem:[#allocation2 + $0x20] sm:$0xff]  ;;  %v825_v27 = vld [vmem:[#allocation2 + $0x28] sm:$0xff]  ;;  %v827_v28 = vld [vmem:[#allocation2 + $0x30] sm:$0xff] }
  0x17   :  { %571 = vmatpush3.msra.mxu0 %v50_v5  ;;  %612 = vmatprep.subr.mxu1 %v187_v12  ;;  %v831_v29 = vld [vmem:[#allocation2 + $0x38] sm:$0xff]  ;;  %v184_v30 = vld [vmem:[%s968_s3 + $0x48] sm:$0xff]  ;;  %v183_v31 = vld [vmem:[%s968_s3 + $0x40] sm:$0xff] }
  0x18   :  { %572 = vmatprep.subr.mxu0 %v49_v6  ;;  %613 = vmatpush3.msra.mxu1 %v187_v12  ;;  %v182_v32 = vld [vmem:[%s968_s3 + $0x38] sm:$0xff]  ;;  %v181_v33 = vld [vmem:[%s968_s3 + $0x30] sm:$0xff]  ;;  %v180_v34 = vld [vmem:[%s968_s3 + $0x28] sm:$0xff] }
  0x19   :  { %573 = vmatpush3.msra.mxu0 %v49_v6  ;;  %614 = vmatprep.subr.mxu1 %v186_v14  ;;  %v179_v35 = vld [vmem:[%s968_s3 + $0x20] sm:$0xff]  ;;  %v178_v36 = vld [vmem:[%s968_s3 + $0x18] sm:$0xff]  ;;  %v177_v37 = vld [vmem:[%s968_s3 + $0x10] sm:$0xff] }
  0x1a   :  { %574 = vmatprep.subr.mxu0 %v48_v9  ;;  %615 = vmatpush3.msra.mxu1 %v186_v14  ;;  %v176_v38 = vld [vmem:[%s968_s3 + $0x8] sm:$0xff]  ;;  %v175_v39 = vld [vmem:[%s968_s3] sm:$0xff]  ;;  %s714_s3 = smov 64  }
  0x1b   :  { %575 = vmatpush3.msra.mxu0 %v48_v9  ;;  %616 = vmatprep.subr.mxu1 %v185_v16  ;;  %v513_v40 = vld [vmem:[%s967_s2] ss:$0 sm:$0xff]  ;;  %s713_s2 = smov 96  }
  0x1c   :  { %576 = vmatprep.subr.mxu0 %v47_v11  ;;  %617 = vmatpush3.msra.mxu1 %v185_v16 }
  0x1d   :  { %577 = vmatpush3.msra.mxu0 %v47_v11  ;;  %618 = vmatprep.subr.mxu1 %v184_v30 }
  0x1e   :  { %578 = vmatprep.subr.mxu0 %v46_v13  ;;  %619 = vmatpush3.msra.mxu1 %v184_v30 }
  0x1f   :  { %579 = vmatpush3.msra.mxu0 %v46_v13  ;;  %620 = vmatprep.subr.mxu1 %v183_v31 }
  0x20   :  { %580 = vmatprep.subr.mxu0 %v45_v15  ;;  %621 = vmatpush3.msra.mxu1 %v183_v31 }
  0x21   :  { %581 = vmatpush3.msra.mxu0 %v45_v15  ;;  %622 = vmatprep.subr.mxu1 %v182_v32 }
  0x22   :  { %582 = vmatprep.subr.mxu0 %v44_v17  ;;  %623 = vmatpush3.msra.mxu1 %v182_v32 }
  0x23   :  { %583 = vmatpush3.msra.mxu0 %v44_v17  ;;  %624 = vmatprep.subr.mxu1 %v181_v33 }
  0x24   :  { %584 = vmatprep.subr.mxu0 %v43_v18  ;;  %625 = vmatpush3.msra.mxu1 %v181_v33 }
  0x25   :  { %585 = vmatpush3.msra.mxu0 %v43_v18  ;;  %626 = vmatprep.subr.mxu1 %v180_v34 }
  0x26   :  { %586 = vmatprep.subr.mxu0 %v42_v19  ;;  %627 = vmatpush3.msra.mxu1 %v180_v34 }
  0x27   :  { %587 = vmatpush3.msra.mxu0 %v42_v19  ;;  %628 = vmatprep.subr.mxu1 %v179_v35 }
  0x28   :  { %588 = vmatprep.subr.mxu0 %v41_v20  ;;  %629 = vmatpush3.msra.mxu1 %v179_v35 }
  0x29   :  { %589 = vmatpush3.msra.mxu0 %v41_v20  ;;  %630 = vmatprep.subr.mxu1 %v178_v36 }
  0x2a   :  { %590 = vmatprep.subr.mxu0 %v40_v21  ;;  %631 = vmatpush3.msra.mxu1 %v178_v36 }
  0x2b   :  { %591 = vmatpush3.msra.mxu0 %v40_v21  ;;  %632 = vmatprep.subr.mxu1 %v177_v37 }
  0x2c   :  { %592 = vmatprep.subr.mxu0 %v39_v22  ;;  %633 = vmatpush3.msra.mxu1 %v177_v37 }
  0x2d   :  { %593 = vmatpush3.msra.mxu0 %v39_v22  ;;  %634 = vmatprep.subr.mxu1 %v176_v38 }
  0x2e   :  { %595 = vmatmul.mubr.f32.vlgmr.msra.gmra.mxu0 %v813_v23  ;;  %635 = vmatpush3.msra.mxu1 %v176_v38 }
  0x2f   :  { %597 = vmatprep.mubr.f32.mxu0 %v815_v24  ;;  %636 = vmatprep.subr.mxu1 %v175_v39 }
  0x30   :  { %637 = vmatpush3.msra.mxu1 %v175_v39 }
  0x32   :  { %598 = vmatmul.mubr.f32.gmra.mxu0 %v819_v25 }
  0x33   :  { %600 = vmatprep.mubr.f32.mxu0 %v821_v26 }
  0x36   :  { %601 = vmatmul.mubr.f32.gmra.mxu0 %v825_v27 }
  0x37   :  { %603 = vmatprep.mubr.f32.mxu0 %v827_v28 }
  0x3a   :  { %604 = vmatmul.mubr.f32.gmra.mxu0 %v831_v29 }
  0xee   :  { %v596_v41 = vpop.f32.mrf.mxu0 }
  0xef   :  { %v134_v42 = vadd.f32 %v596_v41, %v513_v40 }
  0xf0   :  { %v128_v43 = vpop.f32.mrf.mxu0 }
  0xf1   :  { %v129_v44 = vadd.f32 %v513_v40, %v128_v43 }
  0xf2   :  { %v599_v45 = vpop.f32.mrf.mxu0 }
  0xf3   :  { %664 = vtanh.f32 %v129_v44  ;;  %v144_v46 = vadd.f32 %v599_v45, %v513_v40  ;;  %v709_v45 = vmov 3  }
  0xf4   :  { %666 = vtanh.f32 %v134_v42  ;;  %v138_v47 = vpop.f32.mrf.mxu0  ;;  %662 = vset.pattern.permute.xlu0 %v709_v45 }
  0xf5   :  { %v139_v48 = vadd.f32 %v513_v40, %v138_v47 }
  0xf6   :  { %v602_v49 = vpop.f32.mrf.mxu0 }
  0xf7   :  { %668 = vtanh.f32 %v139_v48  ;;  %v154_v50 = vadd.f32 %v602_v49, %v513_v40 }
  0xf8   :  { %670 = vtanh.f32 %v144_v46  ;;  %v148_v51 = vpop.f32.mrf.mxu0  ;;  %v710_v46 = vmov 1  }
  0xf9   :  { %v149_v52 = vadd.f32 %v513_v40, %v148_v51  ;;  %660 = vset.pattern.permute.xlu1 %v710_v46  ;;  %v712_v51 = vmov 0  }
  0xfa   :  { %v605_v53 = vpop.f32.mrf.mxu0 }
  0xfb   :  { %672 = vtanh.f32 %v149_v52  ;;  %v164_v54 = vadd.f32 %v605_v53, %v513_v40 }
  0xfc   :  { %674 = vtanh.f32 %v154_v50  ;;  %v158_v55 = vpop.f32.mrf.mxu0  ;;  %v711_v50 = vmov 2  }
  0xfd   :  { %v159_v56 = vadd.f32 %v513_v40, %v158_v55 }
  0xff   :  { %676 = vtanh.f32 %v159_v56 }
 0x100   :  { %v665_v57 = vpop.eup %664  ;;  %678 = vtanh.f32 %v164_v54 }
 0x101   :  { %v667_v58 = vpop.eup %666  ;;  %638 = vmatprep.mubr.f32.mxu1 %v665_v57 }
 0x102   :  { %639 = vmatmul.mubr.f32.vlgmr.msra.gmra.mxu1 %v667_v58 }
 0x104   :  { %v669_v59 = vpop.eup %668 }
 0x105   :  { %v671_v60 = vpop.eup %670  ;;  %641 = vmatprep.mubr.f32.mxu1 %v669_v59 }
 0x106   :  { %642 = vmatmul.mubr.f32.gmra.mxu1 %v671_v60 }
 0x108   :  { %v673_v61 = vpop.eup %672 }
 0x109   :  { %v675_v62 = vpop.eup %674  ;;  %644 = vmatprep.mubr.f32.mxu1 %v673_v61 }
 0x10a   :  { %645 = vmatmul.mubr.f32.gmra.mxu1 %v675_v62 }
 0x10c   :  { %v677_v63 = vpop.eup %676 }
 0x10d   :  { %v679_v0 = vpop.eup %678  ;;  %647 = vmatprep.mubr.f32.mxu1 %v677_v63 }
 0x10e   :  { %648 = vmatmul.mubr.f32.gmra.mxu1 %v679_v0 }
 0x1c2   :  { %v640_v1 = vpop.f32.mrf.mxu1 }
 0x1c3   :  { %v298_v6 = vsel %vm296_vm0, %v640_v1, 0.0 }
 0x1c4   :  { %v257_v2 = vpop.f32.mrf.mxu1 }
 0x1c5   :  { %v297_v3 = vsel %vm296_vm0, %v257_v2, 0.0 }
 0x1c6   :  { %v643_v5 = vpop.f32.mrf.mxu1  ;;  %v299_v7 = vadd.f32 %v298_v6, %v297_v3 }
 0x1c7   :  { %v302_v12 = vsel %vm296_vm0, %v643_v5, 0.0 }
 0x1c8   :  { %v267_v8 = vpop.f32.mrf.mxu1 }
 0x1c9   :  { %v300_v9 = vsel %vm296_vm0, %v267_v8, 0.0 }
 0x1ca   :  { %v301_v10 = vadd.f32 %v300_v9, %v299_v7  ;;  %v646_v11 = vpop.f32.mrf.mxu1 }
 0x1cb   :  { %v306_v18 = vsel %vm296_vm0, %v646_v11, 0.0 }
 0x1cc   :  { %v277_v13 = vpop.f32.mrf.mxu1  ;;  %v303_v14 = vadd.f32 %v302_v12, %v301_v10 }
 0x1cd   :  { %v304_v15 = vsel %vm296_vm0, %v277_v13, 0.0 }
 0x1ce   :  { %v305_v16 = vadd.f32 %v304_v15, %v303_v14  ;;  %v649_v17 = vpop.f32.mrf.mxu1 }
 0x1cf   :  { %v310_v30 = vsel %vm296_vm0, %v649_v17, 0.0 }
 0x1d0   :  { %v287_v19 = vpop.f32.mrf.mxu1  ;;  %v307_v20 = vadd.f32 %v306_v18, %v305_v16 }
 0x1d1   :  { %v308_v21 = vsel %vm296_vm0, %v287_v19, 0.0 }
 0x1d2   :  { %v309_v22 = vadd.f32 %v308_v21, %v307_v20 }
 0x1d4   :  { %v311_v31 = vadd.f32 %v310_v30, %v309_v22 }
 0x1d6   :  { %v312_v32 = vrot.slane %v311_v31, 4 }
 0x1d8   :  { %v313_v33 = vadd.f32 %v312_v32, %v311_v31 }
 0x1da   :  { %v314_v34 = vrot.slane %v313_v33, 2 }
 0x1dc   :  { %v315_v35 = vadd.f32 %v314_v34, %v313_v33 }
 0x1de   :  { %v316_v36 = vrot.slane %v315_v35, 1 }
 0x1e0   :  { %v317_v37 = vadd.f32 %v316_v36, %v315_v35 }
 0x1e2   :  { %v318_v38 = vmul.f32 0.015625, %v317_v37 }
 0x1e4   :  { %v319_v39 = vsel %vm296_vm0, %v318_v38, -inf }
 0x1e5   :  { %320 = vmax.xlane.f32.xlu0 %v319_v39 }
 0x26e   :  { %v321_v40 = vpop.xlane.xlu0 %320 }
 0x26f   :  { %v322_v41 = vsub.f32 %v318_v38, %v321_v40 }
 0x271   :  { %v323_v42 = vmul.f32 1.442695, %v322_v41 }
 0x273   :  { %680 = vpow2.f32 %v323_v42 }
 0x280   :  { %v681_v43 = vpop.eup %680 }
 0x281   :  { %v325_v44 = vsel %vm296_vm0, %v681_v43, 0.0 }
 0x282   :  { %326 = vadd.xlane.f32.xlu0 %v325_v44 }
 0x30b   :  { %v327_v47 = vpop.xlane.xlu0 %326 }
 0x30c   :  { %682 = vrcp.f32 %v327_v47 }
 0x319   :  { %v683_v48 = vpop.eup %682 }
 0x31a   :  { %v329_v49 = vmul.f32 %v683_v48, %v681_v43 }
 0x31c   :  { %448 = vperm.xlu0 %662, %v329_v49   ;;  %344 = vperm.xlu1 %660, %v329_v49  }
 0x320   :  { %661 = vset.pattern.permute.xlu1 %v711_v50 }
 0x321   :  { %396 = vperm.xlu1 %661, %v329_v49  }
 0x325   :  { %663 = vset.pattern.permute.xlu1 %v712_v51 }
 0x326   :  { %332 = vperm.xlu1 %663, %v329_v49  }
 0x397   :  { %v345_v52 = vpop.permute.xlu1 %344  ;;  %v449_v61 = vpop.permute.xlu0 %448 }
 0x398   :  { %v347_v53 = vmul.f32 %v345_v52, %v756_v4  ;;  %v348_v55 = vmul.f32 %v345_v52, %v813_v23  ;;  %v349_v57 = vmul.f32 %v345_v52, %v815_v24  ;;  %v350_v59 = vmul.f32 %v345_v52, %v819_v25 }
 0x399   :  { %v351_v62 = vmul.f32 %v345_v52, %v821_v26  ;;  %v451_v63 = vmul.f32 %v449_v61, %v756_v4  ;;  %v352_v0 = vmul.f32 %v345_v52, %v825_v27  ;;  %v453_v1 = vmul.f32 %v449_v61, %v815_v24 }
 0x39a   :  { %363 = vrot.lane.b32.xlu1 %v347_v53, %s713_s2  ;;  %v353_v2 = vmul.f32 %v345_v52, %v827_v28  ;;  %v455_v3 = vmul.f32 %v449_v61, %v821_v26  ;;  %v354_v5 = vmul.f32 %v345_v52, %v831_v29  ;;  %v457_v6 = vmul.f32 %v449_v61, %v827_v28 }
 0x39b   :  { %v452_v12 = vmul.f32 %v449_v61, %v813_v23  ;;  %v454_v13 = vmul.f32 %v449_v61, %v819_v25  ;;  %v456_v14 = vmul.f32 %v449_v61, %v825_v27  ;;  %v458_v15 = vmul.f32 %v449_v61, %v831_v29 }
 0x39c   :  { %v397_v54 = vpop.permute.xlu1 %396 }
 0x39d   :  { %v401_v56 = vmul.f32 %v397_v54, %v815_v24  ;;  %v403_v58 = vmul.f32 %v397_v54, %v821_v26  ;;  %v405_v60 = vmul.f32 %v397_v54, %v827_v28  ;;  %v399_v7 = vmul.f32 %v397_v54, %v756_v4 }
 0x39e   :  { %365 = vrot.lane.b32.xlu1 %v348_v55, %s713_s2  ;;  %v400_v8 = vmul.f32 %v397_v54, %v813_v23  ;;  %v402_v9 = vmul.f32 %v397_v54, %v819_v25  ;;  %v404_v10 = vmul.f32 %v397_v54, %v825_v27  ;;  %v406_v11 = vmul.f32 %v397_v54, %v831_v29 }
 0x39f   :  { %419 = vrot.lane.b32.xlu0 %v401_v56, %s714_s3 }
 0x3a1   :  { %v333_v16 = vpop.permute.xlu1 %332 }
 0x3a2   :  { %367 = vrot.lane.b32.xlu1 %v349_v57, %s713_s2  ;;  %v337_v31 = vmul.f32 %v333_v16, %v815_v24  ;;  %v339_v35 = vmul.f32 %v333_v16, %v821_v26  ;;  %v341_v41 = vmul.f32 %v333_v16, %v827_v28  ;;  %v335_v47 = vmul.f32 %v333_v16, %v756_v4 }
 0x3a3   :  { %423 = vrot.lane.b32.xlu0 %v403_v58, %s714_s3  ;;  %v336_v4 = vmul.f32 %v333_v16, %v813_v23  ;;  %v338_v58 = vmul.f32 %v333_v16, %v819_v25  ;;  %v342_v23 = vmul.f32 %v333_v16, %v831_v29 }
 0x3a6   :  { %369 = vrot.lane.b32.xlu1 %v350_v59, %s713_s2 }
 0x3a7   :  { %427 = vrot.lane.b32.xlu0 %v405_v60, %s714_s3 }
 0x3aa   :  { %371 = vrot.lane.b32.xlu1 %v351_v62, %s713_s2 }
 0x3ab   :  { %467 = vrot.lane.b32.xlu0 %v451_v63, %s715_s6  ;;  %v340_v63 = vmul.f32 %v333_v16, %v825_v27 }
 0x3ae   :  { %373 = vrot.lane.b32.xlu1 %v352_v0, %s713_s2 }
 0x3af   :  { %471 = vrot.lane.b32.xlu0 %v453_v1, %s715_s6 }
 0x3b2   :  { %375 = vrot.lane.b32.xlu1 %v353_v2, %s713_s2 }
 0x3b3   :  { %475 = vrot.lane.b32.xlu0 %v455_v3, %s715_s6 }
 0x3b6   :  { %377 = vrot.lane.b32.xlu1 %v354_v5, %s713_s2 }
 0x3b7   :  { %479 = vrot.lane.b32.xlu0 %v457_v6, %s715_s6 }
 0x3ba   :  { %415 = vrot.lane.b32.xlu1 %v399_v7, %s714_s3 }
 0x3be   :  { %417 = vrot.lane.b32.xlu1 %v400_v8, %s714_s3 }
 0x3c2   :  { %421 = vrot.lane.b32.xlu1 %v402_v9, %s714_s3 }
 0x3c6   :  { %425 = vrot.lane.b32.xlu1 %v404_v10, %s714_s3 }
 0x3ca   :  { %429 = vrot.lane.b32.xlu1 %v406_v11, %s714_s3 }
 0x3ce   :  { %469 = vrot.lane.b32.xlu1 %v452_v12, %s715_s6 }
 0x3d2   :  { %473 = vrot.lane.b32.xlu1 %v454_v13, %s715_s6 }
 0x3d6   :  { %477 = vrot.lane.b32.xlu1 %v456_v14, %s715_s6 }
 0x3da   :  { %481 = vrot.lane.b32.xlu1 %v458_v15, %s715_s6 }
 0x40c   :  { %v364_v17 = vpop.permute.xlu1 %363 }
 0x40d   :  { %v387_v49 = vadd.f32 %v364_v17, %v335_v47 }
 0x410   :  { %v366_v18 = vpop.permute.xlu1 %365 }
 0x411   :  { %v420_v19 = vpop.permute.xlu0 %419  ;;  %v388_v57 = vadd.f32 %v366_v18, %v336_v4 }
 0x414   :  { %v368_v20 = vpop.permute.xlu1 %367 }
 0x415   :  { %v424_v21 = vpop.permute.xlu0 %423  ;;  %v389_v32 = vadd.f32 %v368_v20, %v337_v31 }
 0x417   :  { %v441_v38 = vadd.f32 %v420_v19, %v389_v32 }
 0x418   :  { %v370_v22 = vpop.permute.xlu1 %369 }
 0x419   :  { %v428_v30 = vpop.permute.xlu0 %427  ;;  %v390_v61 = vadd.f32 %v370_v22, %v338_v58 }
 0x41c   :  { %v372_v33 = vpop.permute.xlu1 %371 }
 0x41d   :  { %v468_v34 = vpop.permute.xlu0 %467  ;;  %v391_v36 = vadd.f32 %v372_v33, %v339_v35 }
 0x41f   :  { %v443_v24 = vadd.f32 %v424_v21, %v391_v36 }
 0x420   :  { %v374_v37 = vpop.permute.xlu1 %373 }
 0x421   :  { %v472_v39 = vpop.permute.xlu0 %471  ;;  %v392_v2 = vadd.f32 %v374_v37, %v340_v63 }
 0x422   :  { %v493_v40 = vadd.f32 %v472_v39, %v441_v38 }
 0x424   :  { %502 = vst.msk [vmem:[%s969_s4 + $0x10] sm:$0xff] %vm499_vm1, %v493_v40  ;;  %v376_v42 = vpop.permute.xlu1 %375 }
 0x425   :  { %v393_v43 = vadd.f32 %v376_v42, %v341_v41  ;;  %v476_v44 = vpop.permute.xlu0 %475 }
 0x426   :  { %v495_v45 = vadd.f32 %v476_v44, %v443_v24 }
 0x427   :  { %v445_v46 = vadd.f32 %v428_v30, %v393_v43 }
 0x428   :  { %504 = vst.msk [vmem:[%s969_s4 + $0x20] sm:$0xff] %vm499_vm1, %v495_v45  ;;  %v378_v26 = vpop.permute.xlu1 %377 }
 0x429   :  { %v480_v28 = vpop.permute.xlu0 %479  ;;  %v394_v6 = vadd.f32 %v378_v26, %v342_v23 }
 0x42a   :  { %v497_v48 = vadd.f32 %v480_v28, %v445_v46 }
 0x42c   :  { %506 = vst.msk [vmem:[%s969_s4 + $0x30] sm:$0xff] %vm499_vm1, %v497_v48  ;;  %v416_v50 = vpop.permute.xlu1 %415 }
 0x42d   :  { %v439_v51 = vadd.f32 %v416_v50, %v387_v49 }
 0x42f   :  { %v491_v52 = vadd.f32 %v468_v34, %v439_v51 }
 0x430   :  { %v418_v53 = vpop.permute.xlu1 %417 }
 0x431   :  { %500 = vst.msk [vmem:[%s969_s4] sm:$0xff] %vm499_vm1, %v491_v52  ;;  %v440_v59 = vadd.f32 %v418_v53, %v388_v57 }
 0x434   :  { %v422_v54 = vpop.permute.xlu1 %421 }
 0x435   :  { %v442_v0 = vadd.f32 %v422_v54, %v390_v61 }
 0x438   :  { %v426_v55 = vpop.permute.xlu1 %425 }
 0x439   :  { %v444_v5 = vadd.f32 %v426_v55, %v392_v2 }
 0x43c   :  { %v430_v56 = vpop.permute.xlu1 %429 }
 0x43d   :  { %v446_v7 = vadd.f32 %v430_v56, %v394_v6 }
 0x440   :  { %v470_v60 = vpop.permute.xlu1 %469 }
 0x441   :  { %v492_v62 = vadd.f32 %v470_v60, %v440_v59 }
 0x443   :  { %501 = vst.msk [vmem:[%s969_s4 + $0x8] sm:$0xff] %vm499_vm1, %v492_v62 }
 0x444   :  { %v474_v1 = vpop.permute.xlu1 %473 }
 0x445   :  { %v494_v3 = vadd.f32 %v474_v1, %v442_v0 }
 0x447   :  { %503 = vst.msk [vmem:[%s969_s4 + $0x18] sm:$0xff] %vm499_vm1, %v494_v3 }
 0x448   :  { %v478_v25 = vpop.permute.xlu1 %477 }
 0x449   :  { %v496_v27 = vadd.f32 %v478_v25, %v444_v5 }
 0x44b   :  { %505 = vst.msk [vmem:[%s969_s4 + $0x28] sm:$0xff] %vm499_vm1, %v496_v27 }
 0x44c   :  { %v482_v8 = vpop.permute.xlu1 %481 }
 0x44d   :  { %v498_v9 = vadd.f32 %v482_v8, %v446_v7 }
 0x44f   :  { %507 = vst.msk [vmem:[%s969_s4 + $0x38] sm:$0xff] %vm499_vm1, %v498_v9 }
 0x450   :  { %512 = vsyncpa [#allocation3], 1 }

</bundles_post_ra>
